<compile_context>
chip_gen: v5e
topology: v5e:2x2
jax: 0.10.0
libtpu: 0.0.40
codegen_flags: <defaults>
</compile_context>

<pallas_src>
import functools

import jax
import jax.numpy as jnp
from jax.experimental import pallas as pl
from jax.experimental.pallas import tpu as pltpu


def _round_up(v, m):
    return (v + m - 1) // m * m


def _pad2d(x, rows, cols):
    pr, pc = rows - x.shape[0], cols - x.shape[1]
    if pr or pc:
        x = jnp.pad(x, ((0, pr), (0, pc)))
    return x


def _choose_tiles(n):
    # Small graphs: a single square tile covering the whole (padded) problem.
    # Large graphs: decouple tm (bounds the f32 accumulator / output block)
    # from tk (streamed A / feature chunk) to raise arithmetic intensity per
    # grid step without inflating resident VMEM (fits 64 MiB v7x comfortably).
    if n <= 512:
        t = _round_up(max(n, 1), 128)
        return t, t
    return 256, 512


# --------------------------------------------------------------------------
# Small projection kernel: Z = X @ Wl  (hoisted out of the reduction loop)
# --------------------------------------------------------------------------
def _project_kernel(x_ref, w_ref, o_ref):
    o_ref[...] = jnp.dot(x_ref[...], w_ref[...],
                         preferred_element_type=jnp.float32).astype(o_ref.dtype)


def _project(x_p, w_p, tz):
    n_pad, fin_pad = x_p.shape
    fout_pad = w_p.shape[1]
    return pl.pallas_call(
        _project_kernel,
        out_shape=jax.ShapeDtypeStruct((n_pad, fout_pad), jnp.bfloat16),
        grid_spec=pltpu.PrefetchScalarGridSpec(
            num_scalar_prefetch=0,
            grid=(n_pad // tz,),
            in_specs=[pl.BlockSpec((tz, fin_pad), lambda i: (i, 0)),
                      pl.BlockSpec((fin_pad, fout_pad), lambda i: (0, 0))],
            out_specs=pl.BlockSpec((tz, fout_pad), lambda i: (i, 0)),
        ),
        compiler_params=pltpu.CompilerParams(
            dimension_semantics=("parallel",)),
    )(x_p, w_p)


# --------------------------------------------------------------------------
# Fused, tiled SAGEConv layer
# --------------------------------------------------------------------------
def sage_conv_kernel(a_ref, agg_ref, xi_ref, wl_ref, wr_ref, inv_ref, b_ref,
                     o_ref, acc_ref, *, apply_relu, pre_project):
    k = pl.program_id(1)

    @pl.when(k == 0)
    def _init():
        acc_ref[...] = jnp.zeros_like(acc_ref)

    # A tile: int8 edge counts -> bf16 for the MXU (HBM stream stays 1 B/elem).
    a = a_ref[...].astype(jnp.float32).astype(jnp.bfloat16)       # [tm, tk]
    acc_ref[...] += jnp.dot(a, agg_ref[...],                       # bf16 x bf16
                            preferred_element_type=jnp.float32)

    @pl.when(k == pl.num_programs(1) - 1)
    def _finalize():
        mean = acc_ref[...] * inv_ref[...]          # exact f32 1/deg row scale
        xi = xi_ref[...]                            # [tm, Fin] bf16 root feats
        root = jnp.dot(xi, wr_ref[...], preferred_element_type=jnp.float32)
        if pre_project:
            out = mean + root                       # agg already rode Wl
        else:
            out = jnp.dot(mean.astype(jnp.bfloat16), wl_ref[...],
                          preferred_element_type=jnp.float32) + root
        out = out + b_ref[...]
        if apply_relu:
            out = jnp.maximum(out, 0.0)
        o_ref[...] = out.astype(o_ref.dtype)


def sage_conv_padded(a_p, inv_p, x_p, wl_p, wr_p, b_p, *, apply_relu,
                     out_dtype, tm, tk):
    n_pad = a_p.shape[0]
    fin_pad = x_p.shape[1]
    fout_pad = wl_p.shape[1]

    # Reassociate so the O(N^2) aggregation rides min(Fin, Fout): project the
    # features ONCE (outside the reduction loop) and stream Z = X @ Wl.
    pre_project = fout_pad < fin_pad
    if pre_project:
        agg = _project(x_p, wl_p, tm)
        agg_w = fout_pad
    else:
        agg = x_p
        agg_w = fin_pad

    flops = 2 * n_pad * n_pad * agg_w + 4 * n_pad * fin_pad * fout_pad
    bytes_accessed = int(
        a_p.size                                   # int8 adjacency (dominant)
        + agg.size * 2 * max(n_pad // tm, 1)       # streamed agg feats (bf16)
        + x_p.size * 2                             # root feats (bf16)
        + (wl_p.size + wr_p.size) * 2              # bf16 weights
        + (b_p.size + inv_p.size) * 4
        + n_pad * fout_pad * jnp.dtype(out_dtype).itemsize)

    kernel = functools.partial(sage_conv_kernel, apply_relu=apply_relu,
                               pre_project=pre_project)

    return pl.pallas_call(
        kernel,
        out_shape=jax.ShapeDtypeStruct((n_pad, fout_pad), out_dtype),
        grid_spec=pltpu.PrefetchScalarGridSpec(
            num_scalar_prefetch=0,
            grid=(n_pad // tm, n_pad // tk),
            in_specs=[
                pl.BlockSpec((tm, tk), lambda i, k: (i, k)),              # A (int8)
                pl.BlockSpec((tk, agg_w), lambda i, k: (k, 0)),           # agg feats
                pl.BlockSpec((tm, fin_pad), lambda i, k: (i, 0)),         # root feats
                pl.BlockSpec((fin_pad, fout_pad), lambda i, k: (0, 0)),   # Wl (bf16)
                pl.BlockSpec((fin_pad, fout_pad), lambda i, k: (0, 0)),   # Wr (bf16)
                pl.BlockSpec((tm, 1), lambda i, k: (i, 0)),               # 1/deg f32
                pl.BlockSpec((1, fout_pad), lambda i, k: (0, 0)),         # bias f32
            ],
            out_specs=pl.BlockSpec((tm, fout_pad), lambda i, k: (i, 0)),
            scratch_shapes=[pltpu.VMEM((tm, agg_w), jnp.float32)],
        ),
        compiler_params=pltpu.CompilerParams(
            dimension_semantics=("parallel", "arbitrary"),
            vmem_limit_bytes=48 * 1024 * 1024,      # safe on 64 MiB v7x parts
        ),
        cost_estimate=pl.CostEstimate(flops=flops, transcendentals=0,
                                      bytes_accessed=bytes_accessed),
    )(a_p, agg, x_p, wl_p, wr_p, inv_p, b_p)


# --------------------------------------------------------------------------
# Glue: dense int8 edge-count matrix + exact f32 reciprocal in-degree.
# TODO(synk): replace the dense O(N^2) adjacency with a CSR/segment layout +
# PrefetchScalarGridSpec gather kernel for large sparse graphs.
# --------------------------------------------------------------------------
def build_adjacency(edge_index, num_nodes):
    src = edge_index[0]  # message source j
    dst = edge_index[1]  # message target i
    counts = jnp.zeros((num_nodes, num_nodes), jnp.int32)
    counts = counts.at[dst, src].add(1)           # duplicate edges counted (PyG mean)
    deg = counts.sum(axis=1, keepdims=True).astype(jnp.float32)
    inv_deg = 1.0 / jnp.maximum(deg, 1.0)         # isolated nodes -> mean 0
    return counts.astype(jnp.int8), inv_deg


# --------------------------------------------------------------------------
# GNNModel forward:  x -> SAGEConv -> relu -> SAGEConv
# --------------------------------------------------------------------------
def gnn_forward(params, x, edge_index):
    n, fin = x.shape
    hid = params["wl1"].shape[1]
    out_ch = params["wl2"].shape[1]

    tm, tk = _choose_tiles(n)
    n_pad = _round_up(n, max(tm, tk))
    fin_pad = _round_up(fin, 128)
    hid_pad = _round_up(hid, 128)
    out_pad = _round_up(out_ch, 128)

    counts, inv_deg = build_adjacency(edge_index, n)
    a_p = _pad2d(counts, n_pad, n_pad)                        # int8
    inv_p = _pad2d(inv_deg, n_pad, 1)                         # f32
    x_p = _pad2d(x, n_pad, fin_pad).astype(jnp.bfloat16)

    wl1 = _pad2d(params["wl1"], fin_pad, hid_pad).astype(jnp.bfloat16)
    wr1 = _pad2d(params["wr1"], fin_pad, hid_pad).astype(jnp.bfloat16)
    b1 = _pad2d(params["b1"], 1, hid_pad).astype(jnp.float32)
    wl2 = _pad2d(params["wl2"], hid_pad, out_pad).astype(jnp.bfloat16)
    wr2 = _pad2d(params["wr2"], hid_pad, out_pad).astype(jnp.bfloat16)
    b2 = _pad2d(params["b2"], 1, out_pad).astype(jnp.float32)

    # Hidden activation stays padded + bf16 between the two layers.
    h_p = sage_conv_padded(a_p, inv_p, x_p, wl1, wr1, b1,
                           apply_relu=True, out_dtype=jnp.bfloat16,
                           tm=tm, tk=tk)
    out_p = sage_conv_padded(a_p, inv_p, h_p, wl2, wr2, b2,
                             apply_relu=False, out_dtype=jnp.float32,
                             tm=tm, tk=tk)
    return out_p[:n, :out_ch]


def init_params(key, in_channels, hidden_channels, out_channels):
    k1, k2, k3, k4 = jax.random.split(key, 4)
    scale1 = 1.0 / jnp.sqrt(in_channels)
    scale2 = 1.0 / jnp.sqrt(hidden_channels)
    return {
        # layer 1 (in -> hidden): lin_l (neighbor, with bias), lin_r (root, no bias)
        "wl1": jax.random.uniform(k1, (in_channels, hidden_channels),
                                  jnp.float32, -scale1, scale1),
        "wr1": jax.random.uniform(k2, (in_channels, hidden_channels),
                                  jnp.float32, -scale1, scale1),
        "b1": jnp.zeros((1, hidden_channels), jnp.float32),
        # layer 2 (hidden -> out)
        "wl2": jax.random.uniform(k3, (hidden_channels, out_channels),
                                  jnp.float32, -scale2, scale2),
        "wr2": jax.random.uniform(k4, (hidden_channels, out_channels),
                                  jnp.float32, -scale2, scale2),
        "b2": jnp.zeros((1, out_channels), jnp.float32),
    }


if __name__ == "__main__":
    # Small deterministic problem: 16 nodes, 8 input features, 32 hidden, 16 out.
    NUM_NODES = 16
    NUM_EDGES = 40
    IN_CH, HID_CH, OUT_CH = 8, 32, 16

    key = jax.random.PRNGKey(0)
    kx, ke_src, ke_dst, kp = jax.random.split(key, 4)

    x = jax.random.normal(kx, (NUM_NODES, IN_CH), jnp.float32)
    edge_index = jnp.stack(
        [
            jax.random.randint(ke_src, (NUM_EDGES,), 0, NUM_NODES),
            jax.random.randint(ke_dst, (NUM_EDGES,), 0, NUM_NODES),
        ],
        axis=0,
    )  # [2, E]

    params = init_params(kp, IN_CH, HID_CH, OUT_CH)

    out = jax.jit(gnn_forward)(params, x, edge_index)
    jax.block_until_ready(out)

    assert out.shape == (NUM_NODES, OUT_CH), out.shape
    print("KERNEL_OK")
</pallas_src>

<mosaic_0001>
module attributes {stable_mosaic.version = 11 : i64} {
  func.func @sage_conv_kernel(%arg0: i32, %arg1: i32, %arg2: memref<128x128xi8, #tpu.memory_space<vmem>>, %arg3: memref<128x128xbf16, #tpu.memory_space<vmem>>, %arg4: memref<128x128xbf16, #tpu.memory_space<vmem>>, %arg5: memref<128x128xbf16, #tpu.memory_space<vmem>>, %arg6: memref<128x128xbf16, #tpu.memory_space<vmem>>, %arg7: memref<128x1xf32, #tpu.memory_space<vmem>>, %arg8: memref<1x128xf32, #tpu.memory_space<vmem>>, %arg9: memref<128x128xbf16, #tpu.memory_space<vmem>>, %arg10: memref<128x128xf32, #tpu.memory_space<vmem>>) attributes {dimension_semantics = [#tpu.dimension_semantics<parallel>, #tpu.dimension_semantics<arbitrary>], iteration_bounds = array<i64: 1, 1>, scalar_prefetch = 0 : i64, scratch_operands = 1 : i64, tpu.core_type = #tpu.core_type<tc>, window_params = [{transform_indices = @transform_0, window_bounds = array<i64: 128, 128>}, {transform_indices = @transform_1, window_bounds = array<i64: 128, 128>}, {transform_indices = @transform_2, window_bounds = array<i64: 128, 128>}, {pipeline_mode = #tpu.pipeline_mode<synchronous>, transform_indices = @transform_3, window_bounds = array<i64: 128, 128>}, {pipeline_mode = #tpu.pipeline_mode<synchronous>, transform_indices = @transform_4, window_bounds = array<i64: 128, 128>}, {transform_indices = @transform_5, window_bounds = array<i64: 128, 1>}, {pipeline_mode = #tpu.pipeline_mode<synchronous>, transform_indices = @transform_6, window_bounds = array<i64: 1, 128>}, {transform_indices = @transform_7, window_bounds = array<i64: 128, 128>}]} {
    %c0_i32 = arith.constant 0 : i32
    %0 = arith.cmpi eq, %arg1, %c0_i32 : i32
    %1 = arith.extui %0 : i1 to i32
    %c0_i32_0 = arith.constant 0 : i32
    %2 = arith.cmpi ne, %1, %c0_i32_0 : i32
    scf.if %2 {
      %cst_10 = arith.constant 0.000000e+00 : f32
      %14 = vector.broadcast %cst_10 : f32 to vector<128x128xf32>
      %c0_11 = arith.constant 0 : index
      %c0_12 = arith.constant 0 : index
      %15 = vector.load %arg10[%c0_11, %c0_12] : memref<128x128xf32, #tpu.memory_space<vmem>>, vector<128x128xf32>
      tpu.vector_store %arg10[%c0_11, %c0_12], %14 {strides = array<i32>} : memref<128x128xf32, #tpu.memory_space<vmem>>, vector<128x128xf32>,
    } else {
    }
    %c0 = arith.constant 0 : index
    %c0_1 = arith.constant 0 : index
    %3 = vector.load %arg2[%c0, %c0_1] : memref<128x128xi8, #tpu.memory_space<vmem>>, vector<128x128xi8>
    %4 = arith.sitofp %3 : vector<128x128xi8> to vector<128x128xf32>
    %5 = arith.truncf %4 : vector<128x128xf32> to vector<128x128xbf16>
    %c0_2 = arith.constant 0 : index
    %c0_3 = arith.constant 0 : index
    %6 = vector.load %arg10[%c0_2, %c0_3] : memref<128x128xf32, #tpu.memory_space<vmem>>, vector<128x128xf32>
    %c0_4 = arith.constant 0 : index
    %c0_5 = arith.constant 0 : index
    %7 = vector.load %arg3[%c0_4, %c0_5] : memref<128x128xbf16, #tpu.memory_space<vmem>>, vector<128x128xbf16>
    %cst = arith.constant dense<0.000000e+00> : vector<128x128xf32>
    %8 = tpu.matmul %5, %7, %cst {dimension_numbers = #tpu.dot_dimension_numbers<[1], [0], [0], [1], [0, 0, 1, 1], [], []>} : vector<128x128xbf16>, vector<128x128xbf16>, vector<128x128xf32> -> vector<128x128xf32>
    %9 = arith.addf %6, %8 : vector<128x128xf32>
    %c0_6 = arith.constant 0 : index
    %c0_7 = arith.constant 0 : index
    %10 = vector.load %arg10[%c0_6, %c0_7] : memref<128x128xf32, #tpu.memory_space<vmem>>, vector<128x128xf32>
    tpu.vector_store %arg10[%c0_6, %c0_7], %9 {strides = array<i32>} : memref<128x128xf32, #tpu.memory_space<vmem>>, vector<128x128xf32>,
    %c0_i32_8 = arith.constant 0 : i32
    %11 = arith.cmpi eq, %arg1, %c0_i32_8 : i32
    %12 = arith.extui %11 : i1 to i32
    %c0_i32_9 = arith.constant 0 : i32
    %13 = arith.cmpi ne, %12, %c0_i32_9 : i32
    scf.if %13 {
      %c0_10 = arith.constant 0 : index
      %c0_11 = arith.constant 0 : index
      %14 = vector.load %arg10[%c0_10, %c0_11] : memref<128x128xf32, #tpu.memory_space<vmem>>, vector<128x128xf32>
      %c0_12 = arith.constant 0 : index
      %c0_13 = arith.constant 0 : index
      %15 = vector.load %arg7[%c0_12, %c0_13] : memref<128x1xf32, #tpu.memory_space<vmem>>, vector<128x1xf32>
      %16 = vector.broadcast %15 : vector<128x1xf32> to vector<128x128xf32>
      %17 = arith.mulf %14, %16 : vector<128x128xf32>
      %c0_14 = arith.constant 0 : index
      %c0_15 = arith.constant 0 : index
      %18 = vector.load %arg4[%c0_14, %c0_15] : memref<128x128xbf16, #tpu.memory_space<vmem>>, vector<128x128xbf16>
      %c0_16 = arith.constant 0 : index
      %c0_17 = arith.constant 0 : index
      %19 = vector.load %arg6[%c0_16, %c0_17] : memref<128x128xbf16, #tpu.memory_space<vmem>>, vector<128x128xbf16>
      %cst_18 = arith.constant dense<0.000000e+00> : vector<128x128xf32>
      %20 = tpu.matmul %18, %19, %cst_18 {dimension_numbers = #tpu.dot_dimension_numbers<[1], [0], [0], [1], [0, 0, 1, 1], [], []>} : vector<128x128xbf16>, vector<128x128xbf16>, vector<128x128xf32> -> vector<128x128xf32>
      %21 = arith.truncf %17 : vector<128x128xf32> to vector<128x128xbf16>
      %c0_19 = arith.constant 0 : index
      %c0_20 = arith.constant 0 : index
      %22 = vector.load %arg5[%c0_19, %c0_20] : memref<128x128xbf16, #tpu.memory_space<vmem>>, vector<128x128xbf16>
      %cst_21 = arith.constant dense<0.000000e+00> : vector<128x128xf32>
      %23 = tpu.matmul %21, %22, %cst_21 {dimension_numbers = #tpu.dot_dimension_numbers<[1], [0], [0], [1], [0, 0, 1, 1], [], []>} : vector<128x128xbf16>, vector<128x128xbf16>, vector<128x128xf32> -> vector<128x128xf32>
      %24 = arith.addf %23, %20 : vector<128x128xf32>
      %c0_22 = arith.constant 0 : index
      %c0_23 = arith.constant 0 : index
      %25 = vector.load %arg8[%c0_22, %c0_23] : memref<1x128xf32, #tpu.memory_space<vmem>>, vector<1x128xf32>
      %26 = vector.broadcast %25 : vector<1x128xf32> to vector<128x128xf32>
      %27 = arith.addf %24, %26 : vector<128x128xf32>
      %cst_24 = arith.constant 0.000000e+00 : f32
      %28 = vector.broadcast %cst_24 : f32 to vector<128x128xf32>
      %29 = arith.maximumf %27, %28 : vector<128x128xf32>
      %30 = arith.truncf %29 : vector<128x128xf32> to vector<128x128xbf16>
      %c0_25 = arith.constant 0 : index
      %c0_26 = arith.constant 0 : index
      %31 = vector.load %arg9[%c0_25, %c0_26] : memref<128x128xbf16, #tpu.memory_space<vmem>>, vector<128x128xbf16>
      tpu.vector_store %arg9[%c0_25, %c0_26], %30 {strides = array<i32>} : memref<128x128xbf16, #tpu.memory_space<vmem>>, vector<128x128xbf16>,
    } else {
    }
    return
  }
  func.func @transform_0(%arg0: i32, %arg1: i32) -> (i32, i32) {
    %c0_i32 = arith.constant 0 : i32
    return %arg0, %arg1 : i32, i32
  }
  func.func @transform_1(%arg0: i32, %arg1: i32) -> (i32, i32) {
    %c0_i32 = arith.constant 0 : i32
    %c0_i32_0 = arith.constant 0 : i32
    return %arg1, %c0_i32 : i32, i32
  }
  func.func @transform_2(%arg0: i32, %arg1: i32) -> (i32, i32) {
    %c0_i32 = arith.constant 0 : i32
    %c0_i32_0 = arith.constant 0 : i32
    return %arg0, %c0_i32 : i32, i32
  }
  func.func @transform_3(%arg0: i32, %arg1: i32) -> (i32, i32) {
    %c0_i32 = arith.constant 0 : i32
    %c0_i32_0 = arith.constant 0 : i32
    %c0_i32_1 = arith.constant 0 : i32
    return %c0_i32, %c0_i32_0 : i32, i32
  }
  func.func @transform_4(%arg0: i32, %arg1: i32) -> (i32, i32) {
    %c0_i32 = arith.constant 0 : i32
    %c0_i32_0 = arith.constant 0 : i32
    %c0_i32_1 = arith.constant 0 : i32
    return %c0_i32, %c0_i32_0 : i32, i32
  }
  func.func @transform_5(%arg0: i32, %arg1: i32) -> (i32, i32) {
    %c0_i32 = arith.constant 0 : i32
    %c0_i32_0 = arith.constant 0 : i32
    return %arg0, %c0_i32 : i32, i32
  }
  func.func @transform_6(%arg0: i32, %arg1: i32) -> (i32, i32) {
    %c0_i32 = arith.constant 0 : i32
    %c0_i32_0 = arith.constant 0 : i32
    %c0_i32_1 = arith.constant 0 : i32
    return %c0_i32, %c0_i32_0 : i32, i32
  }
  func.func @transform_7(%arg0: i32, %arg1: i32) -> (i32, i32) {
    %c0_i32 = arith.constant 0 : i32
    %c0_i32_0 = arith.constant 0 : i32
    return %arg0, %c0_i32 : i32, i32
  }
}

module attributes {stable_mosaic.version = 11 : i64} {
  func.func @sage_conv_kernel(%arg0: i32, %arg1: i32, %arg2: memref<128x128xi8, #tpu.memory_space<vmem>>, %arg3: memref<128x128xbf16, #tpu.memory_space<vmem>>, %arg4: memref<128x128xbf16, #tpu.memory_space<vmem>>, %arg5: memref<128x128xbf16, #tpu.memory_space<vmem>>, %arg6: memref<128x128xbf16, #tpu.memory_space<vmem>>, %arg7: memref<128x1xf32, #tpu.memory_space<vmem>>, %arg8: memref<1x128xf32, #tpu.memory_space<vmem>>, %arg9: memref<128x128xf32, #tpu.memory_space<vmem>>, %arg10: memref<128x128xf32, #tpu.memory_space<vmem>>) attributes {dimension_semantics = [#tpu.dimension_semantics<parallel>, #tpu.dimension_semantics<arbitrary>], iteration_bounds = array<i64: 1, 1>, scalar_prefetch = 0 : i64, scratch_operands = 1 : i64, tpu.core_type = #tpu.core_type<tc>, window_params = [{transform_indices = @transform_0, window_bounds = array<i64: 128, 128>}, {transform_indices = @transform_1, window_bounds = array<i64: 128, 128>}, {transform_indices = @transform_2, window_bounds = array<i64: 128, 128>}, {pipeline_mode = #tpu.pipeline_mode<synchronous>, transform_indices = @transform_3, window_bounds = array<i64: 128, 128>}, {pipeline_mode = #tpu.pipeline_mode<synchronous>, transform_indices = @transform_4, window_bounds = array<i64: 128, 128>}, {transform_indices = @transform_5, window_bounds = array<i64: 128, 1>}, {pipeline_mode = #tpu.pipeline_mode<synchronous>, transform_indices = @transform_6, window_bounds = array<i64: 1, 128>}, {transform_indices = @transform_7, window_bounds = array<i64: 128, 128>}]} {
    %c0_i32 = arith.constant 0 : i32
    %0 = arith.cmpi eq, %arg1, %c0_i32 : i32
    %1 = arith.extui %0 : i1 to i32
    %c0_i32_0 = arith.constant 0 : i32
    %2 = arith.cmpi ne, %1, %c0_i32_0 : i32
    scf.if %2 {
      %cst_10 = arith.constant 0.000000e+00 : f32
      %14 = vector.broadcast %cst_10 : f32 to vector<128x128xf32>
      %c0_11 = arith.constant 0 : index
      %c0_12 = arith.constant 0 : index
      %15 = vector.load %arg10[%c0_11, %c0_12] : memref<128x128xf32, #tpu.memory_space<vmem>>, vector<128x128xf32>
      tpu.vector_store %arg10[%c0_11, %c0_12], %14 {strides = array<i32>} : memref<128x128xf32, #tpu.memory_space<vmem>>, vector<128x128xf32>,
    } else {
    }
    %c0 = arith.constant 0 : index
    %c0_1 = arith.constant 0 : index
    %3 = vector.load %arg2[%c0, %c0_1] : memref<128x128xi8, #tpu.memory_space<vmem>>, vector<128x128xi8>
    %4 = arith.sitofp %3 : vector<128x128xi8> to vector<128x128xf32>
    %5 = arith.truncf %4 : vector<128x128xf32> to vector<128x128xbf16>
    %c0_2 = arith.constant 0 : index
    %c0_3 = arith.constant 0 : index
    %6 = vector.load %arg10[%c0_2, %c0_3] : memref<128x128xf32, #tpu.memory_space<vmem>>, vector<128x128xf32>
    %c0_4 = arith.constant 0 : index
    %c0_5 = arith.constant 0 : index
    %7 = vector.load %arg3[%c0_4, %c0_5] : memref<128x128xbf16, #tpu.memory_space<vmem>>, vector<128x128xbf16>
    %cst = arith.constant dense<0.000000e+00> : vector<128x128xf32>
    %8 = tpu.matmul %5, %7, %cst {dimension_numbers = #tpu.dot_dimension_numbers<[1], [0], [0], [1], [0, 0, 1, 1], [], []>} : vector<128x128xbf16>, vector<128x128xbf16>, vector<128x128xf32> -> vector<128x128xf32>
    %9 = arith.addf %6, %8 : vector<128x128xf32>
    %c0_6 = arith.constant 0 : index
    %c0_7 = arith.constant 0 : index
    %10 = vector.load %arg10[%c0_6, %c0_7] : memref<128x128xf32, #tpu.memory_space<vmem>>, vector<128x128xf32>
    tpu.vector_store %arg10[%c0_6, %c0_7], %9 {strides = array<i32>} : memref<128x128xf32, #tpu.memory_space<vmem>>, vector<128x128xf32>,
    %c0_i32_8 = arith.constant 0 : i32
    %11 = arith.cmpi eq, %arg1, %c0_i32_8 : i32
    %12 = arith.extui %11 : i1 to i32
    %c0_i32_9 = arith.constant 0 : i32
    %13 = arith.cmpi ne, %12, %c0_i32_9 : i32
    scf.if %13 {
      %c0_10 = arith.constant 0 : index
      %c0_11 = arith.constant 0 : index
      %14 = vector.load %arg10[%c0_10, %c0_11] : memref<128x128xf32, #tpu.memory_space<vmem>>, vector<128x128xf32>
      %c0_12 = arith.constant 0 : index
      %c0_13 = arith.constant 0 : index
      %15 = vector.load %arg7[%c0_12, %c0_13] : memref<128x1xf32, #tpu.memory_space<vmem>>, vector<128x1xf32>
      %16 = vector.broadcast %15 : vector<128x1xf32> to vector<128x128xf32>
      %17 = arith.mulf %14, %16 : vector<128x128xf32>
      %c0_14 = arith.constant 0 : index
      %c0_15 = arith.constant 0 : index
      %18 = vector.load %arg4[%c0_14, %c0_15] : memref<128x128xbf16, #tpu.memory_space<vmem>>, vector<128x128xbf16>
      %c0_16 = arith.constant 0 : index
      %c0_17 = arith.constant 0 : index
      %19 = vector.load %arg6[%c0_16, %c0_17] : memref<128x128xbf16, #tpu.memory_space<vmem>>, vector<128x128xbf16>
      %cst_18 = arith.constant dense<0.000000e+00> : vector<128x128xf32>
      %20 = tpu.matmul %18, %19, %cst_18 {dimension_numbers = #tpu.dot_dimension_numbers<[1], [0], [0], [1], [0, 0, 1, 1], [], []>} : vector<128x128xbf16>, vector<128x128xbf16>, vector<128x128xf32> -> vector<128x128xf32>
      %21 = arith.truncf %17 : vector<128x128xf32> to vector<128x128xbf16>
      %c0_19 = arith.constant 0 : index
      %c0_20 = arith.constant 0 : index
      %22 = vector.load %arg5[%c0_19, %c0_20] : memref<128x128xbf16, #tpu.memory_space<vmem>>, vector<128x128xbf16>
      %cst_21 = arith.constant dense<0.000000e+00> : vector<128x128xf32>
      %23 = tpu.matmul %21, %22, %cst_21 {dimension_numbers = #tpu.dot_dimension_numbers<[1], [0], [0], [1], [0, 0, 1, 1], [], []>} : vector<128x128xbf16>, vector<128x128xbf16>, vector<128x128xf32> -> vector<128x128xf32>
      %24 = arith.addf %23, %20 : vector<128x128xf32>
      %c0_22 = arith.constant 0 : index
      %c0_23 = arith.constant 0 : index
      %25 = vector.load %arg8[%c0_22, %c0_23] : memref<1x128xf32, #tpu.memory_space<vmem>>, vector<1x128xf32>
      %26 = vector.broadcast %25 : vector<1x128xf32> to vector<128x128xf32>
      %27 = arith.addf %24, %26 : vector<128x128xf32>
      %c0_24 = arith.constant 0 : index
      %c0_25 = arith.constant 0 : index
      %28 = vector.load %arg9[%c0_24, %c0_25] : memref<128x128xf32, #tpu.memory_space<vmem>>, vector<128x128xf32>
      tpu.vector_store %arg9[%c0_24, %c0_25], %27 {strides = array<i32>} : memref<128x128xf32, #tpu.memory_space<vmem>>, vector<128x128xf32>,
    } else {
    }
    return
  }
  func.func @transform_0(%arg0: i32, %arg1: i32) -> (i32, i32) {
    %c0_i32 = arith.constant 0 : i32
    return %arg0, %arg1 : i32, i32
  }
  func.func @transform_1(%arg0: i32, %arg1: i32) -> (i32, i32) {
    %c0_i32 = arith.constant 0 : i32
    %c0_i32_0 = arith.constant 0 : i32
    return %arg1, %c0_i32 : i32, i32
  }
  func.func @transform_2(%arg0: i32, %arg1: i32) -> (i32, i32) {
    %c0_i32 = arith.constant 0 : i32
    %c0_i32_0 = arith.constant 0 : i32
    return %arg0, %c0_i32 : i32, i32
  }
  func.func @transform_3(%arg0: i32, %arg1: i32) -> (i32, i32) {
    %c0_i32 = arith.constant 0 : i32
    %c0_i32_0 = arith.constant 0 : i32
    %c0_i32_1 = arith.constant 0 : i32
    return %c0_i32, %c0_i32_0 : i32, i32
  }
  func.func @transform_4(%arg0: i32, %arg1: i32) -> (i32, i32) {
    %c0_i32 = arith.constant 0 : i32
    %c0_i32_0 = arith.constant 0 : i32
    %c0_i32_1 = arith.constant 0 : i32
    return %c0_i32, %c0_i32_0 : i32, i32
  }
  func.func @transform_5(%arg0: i32, %arg1: i32) -> (i32, i32) {
    %c0_i32 = arith.constant 0 : i32
    %c0_i32_0 = arith.constant 0 : i32
    return %arg0, %c0_i32 : i32, i32
  }
  func.func @transform_6(%arg0: i32, %arg1: i32) -> (i32, i32) {
    %c0_i32 = arith.constant 0 : i32
    %c0_i32_0 = arith.constant 0 : i32
    %c0_i32_1 = arith.constant 0 : i32
    return %c0_i32, %c0_i32_0 : i32, i32
  }
  func.func @transform_7(%arg0: i32, %arg1: i32) -> (i32, i32) {
    %c0_i32 = arith.constant 0 : i32
    %c0_i32_0 = arith.constant 0 : i32
    return %arg0, %c0_i32 : i32, i32
  }
}

</mosaic_0001>

<bundles_post_ra>
// kernel: gnn_forward.3
= control target key start
LH: loop header
LB: loop body
LE: loop exit
PB: predicated region body
PF: predicated region fallthrough
CT: control target
= control target key end

     0   :  { %v909_v1 = vmov 0   ;;  %s1175_s1 = inlined_call_operand.vmem [shape: bf16[128,128], index: 1, kind: input, shape index: {}, may-alias: {1,2}]   ;;  %s1176_s5 = inlined_call_operand.vmem [shape: f32[128,1], index: 5, kind: input, shape index: {}]   ;;  %s1177_s0 = inlined_call_operand.vmem [shape: s8[128,128], index: 0, kind: input, shape index: {}]   ;;  %s1178_s4 = inlined_call_operand.vmem [shape: bf16[128,128], index: 4, kind: input, shape index: {}]   ;;  %s1179_s3 = inlined_call_operand.vmem [shape: bf16[128,128], index: 3, kind: input, shape index: {}]   ;;  %s1180_s2 = inlined_call_operand.vmem [shape: bf16[128,128], index: 2, kind: input, shape index: {}, may-alias: {1,2}]   ;;  %s1181_s6 = inlined_call_operand.vmem [shape: f32[1,128], index: 6, kind: input, shape index: {}]   ;;  %s1182_s7 = inlined_call_operand.vmem [shape: f32[128,128], index: 7, kind: output, shape index: {}]  }
   0x1   :  { %v855_v0 = vld [vmem:[%s1175_s1 + $0x38] sm:$0xff]  ;;  %905 = vset.pattern.permute.xlu0 %v909_v1  ;;  %v270_v2 = vld [vmem:[%s1176_s5] sm:$0xff]  ;;  %906 = vset.pattern.permute.xlu1 %v909_v1  ;;  %v854_v3 = vld [vmem:[%s1175_s1 + $0x30] sm:$0xff] }
   0x2   :  { %288 = vperm.xlu0 %905, %v270_v2   ;;  %907 = vset.pattern.permute.xlu2 %v909_v1  ;;  %v272_v4 = vld [vmem:[%s1176_s5 + $0x10] sm:$0xff]  ;;  %v853_v5 = vld [vmem:[%s1175_s1 + $0x28] sm:$0xff]  ;;  %v273_v7 = vld [vmem:[%s1176_s5 + $0x18] sm:$0xff] }
   0x3   :  { %170 = vmatpush.bf16.msra.mxu0 %v855_v0  ;;  %880 = vmatpush.bf16.msra.mxu3 %v855_v0  ;;  %v271_v6 = vld [vmem:[%s1176_s5 + $0x8] sm:$0xff]  ;;  %v852_v8 = vld [vmem:[%s1175_s1 + $0x20] sm:$0xff]  ;;  %v851_v9 = vld [vmem:[%s1175_s1 + $0x18] sm:$0xff] }
   0x4   :  { %298 = vperm.xlu1 %906, %v272_v4   ;;  %v276_v10 = vld [vmem:[%s1176_s5 + $0x30] sm:$0xff]  ;;  %v277_v11 = vld [vmem:[%s1176_s5 + $0x38] sm:$0xff]  ;;  %v274_v12 = vld [vmem:[%s1176_s5 + $0x20] sm:$0xff] }
   0x5   :  { %v850_v13 = vld [vmem:[%s1175_s1 + $0x10] sm:$0xff]  ;;  %v46_v14 = vld [vmem:[%s1177_s0] sm:$0xff]  ;;  %v49_v15 = vld [vmem:[%s1177_s0 + $0x18] sm:$0xff]  ;;  %308 = vperm.xlu2 %907, %v274_v12  }
   0x6   :  { %v50_v16 = vunpack.c.0.s8 %v46_v14  ;;  %v51_v17 = vunpack.c.1.s8 %v46_v14  ;;  %v62_v18 = vunpack.c.0.s8 %v49_v15  ;;  %v63_v19 = vunpack.c.1.s8 %v49_v15  ;;  %v849_v20 = vld [vmem:[%s1175_s1 + $0x8] sm:$0xff]  ;;  %v282_v26 = vld [vmem:[%s1176_s5 + $0x60] sm:$0xff]  ;;  %v280_v30 = vld [vmem:[%s1176_s5 + $0x50] sm:$0xff] }
   0x7   :  { %171 = vmatpush.bf16.msra.mxu0 %v854_v3  ;;  %881 = vmatpush.bf16.msra.mxu3 %v854_v3  ;;  %v279_v21 = vld [vmem:[%s1176_s5 + $0x48] sm:$0xff]  ;;  %v848_v27 = vld [vmem:[%s1175_s1] sm:$0xff]  ;;  %v281_v31 = vld [vmem:[%s1176_s5 + $0x58] sm:$0xff]  ;;  %v52_v33 = vunpack.c.2.s8 %v46_v14  ;;  %v53_v34 = vunpack.c.3.s8 %v46_v14  ;;  %v64_v35 = vunpack.c.2.s8 %v49_v15  ;;  %v65_v36 = vunpack.c.3.s8 %v49_v15 }
   0x8   :  { %v66_v22 = vcvt.s32.f32 %v50_v16  ;;  %v67_v23 = vcvt.s32.f32 %v51_v17  ;;  %v78_v24 = vcvt.s32.f32 %v62_v18  ;;  %v79_v25 = vcvt.s32.f32 %v63_v19  ;;  %v275_v32 = vld [vmem:[%s1176_s5 + $0x28] sm:$0xff]  ;;  %v285_v37 = vld [vmem:[%s1176_s5 + $0x78] sm:$0xff]  ;;  %v278_v38 = vld [vmem:[%s1176_s5 + $0x40] sm:$0xff] }
   0x9   :  { %v68_v39 = vcvt.s32.f32 %v52_v33  ;;  %v69_v40 = vcvt.s32.f32 %v53_v34  ;;  %v80_v41 = vcvt.s32.f32 %v64_v35  ;;  %v81_v42 = vcvt.s32.f32 %v65_v36  ;;  %v283_v45 = vld [vmem:[%s1176_s5 + $0x68] sm:$0xff]  ;;  %v284_v52 = vld [vmem:[%s1176_s5 + $0x70] sm:$0xff]  ;;  %v871_v58 = vld [vmem:[%s1178_s4 + $0x38] sm:$0xff] }
   0xa   :  { %293 = vperm.xlu0 %905, %v271_v6   ;;  %v82_v28 = vpack.c.bf16 %v67_v23, %v66_v22  ;;  %v88_v29 = vpack.c.bf16 %v79_v25, %v78_v24  ;;  %v47_v46 = vld [vmem:[%s1177_s0 + $0x8] sm:$0xff]  ;;  %v48_v59 = vld [vmem:[%s1177_s0 + $0x10] sm:$0xff]  ;;  %510 = vmatpush.bf16.msra.mxu1 %v871_v58  ;;  %v868_v2 = vld [vmem:[%s1178_s4 + $0x20] sm:$0xff] }
   0xb   :  { %172 = vmatpush.bf16.msra.mxu0 %v853_v5  ;;  %882 = vmatpush.bf16.msra.mxu3 %v853_v5  ;;  %v83_v43 = vpack.c.bf16 %v69_v40, %v68_v39  ;;  %v89_v44 = vpack.c.bf16 %v81_v42, %v80_v41  ;;  %v54_v47 = vunpack.c.0.s8 %v47_v46  ;;  %v55_v48 = vunpack.c.1.s8 %v47_v46  ;;  %v870_v60 = vld [vmem:[%s1178_s4 + $0x30] sm:$0xff]  ;;  %v869_v63 = vld [vmem:[%s1178_s4 + $0x28] sm:$0xff]  ;;  %v867_v4 = vld [vmem:[%s1178_s4 + $0x18] sm:$0xff] }
   0xc   :  { %303 = vperm.xlu1 %906, %v273_v7   ;;  %v56_v53 = vunpack.c.2.s8 %v47_v46  ;;  %v57_v54 = vunpack.c.3.s8 %v47_v46  ;;  %v58_v61 = vunpack.c.0.s8 %v48_v59  ;;  %v59_v62 = vunpack.c.1.s8 %v48_v59  ;;  %v866_v5 = vld [vmem:[%s1178_s4 + $0x10] sm:$0xff]  ;;  %v879_v6 = vld [vmem:[%s1179_s3 + $0x38] sm:$0xff]  ;;  %v864_v12 = vld [vmem:[%s1178_s4] sm:$0xff] }
   0xd   :  { %313 = vperm.xlu2 %907, %v275_v32   ;;  %v70_v49 = vcvt.s32.f32 %v54_v47  ;;  %v71_v50 = vcvt.s32.f32 %v55_v48  ;;  %v60_v7 = vunpack.c.2.s8 %v48_v59  ;;  %631 = vmatpush.bf16.msra.mxu2 %v879_v6  ;;  %v862_v15 = vld [vmem:[%s1180_s2 + $0x30] sm:$0xff]  ;;  %v877_v16 = vld [vmem:[%s1179_s3 + $0x28] sm:$0xff]  ;;  %v876_v17 = vld [vmem:[%s1179_s3 + $0x20] sm:$0xff] }
   0xe   :  { %v72_v55 = vcvt.s32.f32 %v56_v53  ;;  %v73_v56 = vcvt.s32.f32 %v57_v54  ;;  %511 = vmatpush.bf16.msra.mxu1 %v870_v60  ;;  %v74_v0 = vcvt.s32.f32 %v58_v61  ;;  %v75_v1 = vcvt.s32.f32 %v59_v62  ;;  %v875_v18 = vld [vmem:[%s1179_s3 + $0x18] sm:$0xff]  ;;  %v874_v19 = vld [vmem:[%s1179_s3 + $0x10] sm:$0xff]  ;;  %v872_v22 = vld [vmem:[%s1179_s3] sm:$0xff] }
   0xf   :  { %173 = vmatpush.bf16.msra.mxu0 %v852_v8  ;;  %883 = vmatpush.bf16.msra.mxu3 %v852_v8  ;;  %v84_v51 = vpack.c.bf16 %v71_v50, %v70_v49  ;;  %v61_v8 = vunpack.c.3.s8 %v48_v59  ;;  %v856_v23 = vld [vmem:[%s1180_s2] sm:$0xff]  ;;  %v858_v39 = vld [vmem:[%s1180_s2 + $0x10] sm:$0xff]  ;;  %v859_v54 = vld [vmem:[%s1180_s2 + $0x18] sm:$0xff] }
  0x10   :  { %v85_v57 = vpack.c.bf16 %v73_v56, %v72_v55  ;;  %v86_v3 = vpack.c.bf16 %v75_v1, %v74_v0 }
  0x12   :  { %318 = vperm.xlu0 %905, %v276_v10   ;;  %512 = vmatpush.bf16.msra.mxu1 %v869_v63  ;;  %v76_v10 = vcvt.s32.f32 %v60_v7 }
  0x13   :  { %174 = vmatpush.bf16.msra.mxu0 %v851_v9  ;;  %884 = vmatpush.bf16.msra.mxu3 %v851_v9  ;;  %v865_v9 = vld [vmem:[%s1178_s4 + $0x8] sm:$0xff] }
  0x14   :  { %323 = vperm.xlu1 %906, %v277_v11   ;;  %v77_v11 = vcvt.s32.f32 %v61_v8  ;;  %v861_v8 = vld [vmem:[%s1180_s2 + $0x28] sm:$0xff] }
  0x15   :  { %328 = vperm.xlu2 %907, %v278_v38  }
  0x16   :  { %513 = vmatpush.bf16.msra.mxu1 %v868_v2  ;;  %v87_v14 = vpack.c.bf16 %v77_v11, %v76_v10 }
  0x17   :  { %175 = vmatpush.bf16.msra.mxu0 %v850_v13  ;;  %885 = vmatpush.bf16.msra.mxu3 %v850_v13  ;;  %v878_v13 = vld [vmem:[%s1179_s3 + $0x30] sm:$0xff] }
  0x18   :  { %632 = vmatpush.bf16.msra.mxu2 %v878_v13 }
  0x1a   :  { %333 = vperm.xlu0 %905, %v279_v21   ;;  %514 = vmatpush.bf16.msra.mxu1 %v867_v4  ;;  %v873_v21 = vld [vmem:[%s1179_s3 + $0x8] sm:$0xff] }
  0x1b   :  { %176 = vmatpush.bf16.msra.mxu0 %v849_v20  ;;  %886 = vmatpush.bf16.msra.mxu3 %v849_v20  ;;  %v863_v20 = vld [vmem:[%s1180_s2 + $0x38] sm:$0xff] }
  0x1c   :  { %348 = vperm.xlu1 %906, %v282_v26   ;;  %633 = vmatpush.bf16.msra.mxu2 %v877_v16 }
  0x1d   :  { %353 = vperm.xlu2 %907, %v283_v45  }
  0x1e   :  { %515 = vmatpush.bf16.msra.mxu1 %v866_v5 }
  0x1f   :  { %177 = vmatpush.bf16.msra.mxu0 %v848_v27  ;;  %887 = vmatpush.bf16.msra.mxu3 %v848_v27 }
  0x20   :  { %634 = vmatpush.bf16.msra.mxu2 %v876_v17 }
  0x22   :  { %178 = vmatmul.bf16.vlgmr.msra.gmra.mxu0 %v82_v28  ;;  %208 = vmatmul.bf16.vlgmr.msra.gmra.mxu3 %v88_v29 }
  0x23   :  { %338 = vperm.xlu0 %905, %v280_v30   ;;  %888 = vmatpush.bf16.msrb.mxu3 %v871_v58  ;;  %v857_v30 = vld [vmem:[%s1180_s2 + $0x8] sm:$0xff] }
  0x24   :  { %343 = vperm.xlu1 %906, %v281_v31   ;;  %516 = vmatpush.bf16.msra.mxu1 %v865_v9 }
  0x25   :  { %358 = vperm.xlu2 %907, %v284_v52   ;;  %635 = vmatpush.bf16.msra.mxu2 %v875_v18 }
  0x27   :  { %889 = vmatpush.bf16.msrb.mxu3 %v870_v60 }
  0x28   :  { %517 = vmatpush.bf16.msra.mxu1 %v864_v12 }
  0x29   :  { %636 = vmatpush.bf16.msra.mxu2 %v874_v19 }
  0x2b   :  { %363 = vperm.xlu0 %905, %v285_v37   ;;  %890 = vmatpush.bf16.msrb.mxu3 %v869_v63 }
  0x2c   :  { %518 = vmatmul.bf16.vlgmr.msra.gmra.mxu1 %v856_v23 }
  0x2d   :  { %637 = vmatpush.bf16.msra.mxu2 %v873_v21 }
  0x2f   :  { %891 = vmatpush.bf16.msrb.mxu3 %v868_v2  ;;  %v860_v2 = vld [vmem:[%s1180_s2 + $0x20] sm:$0xff] }
  0x31   :  { %638 = vmatpush.bf16.msra.mxu2 %v872_v22 }
  0x32   :  { %183 = vmatmul.bf16.gmra.mxu0 %v83_v43  ;;  %213 = vmatmul.bf16.gmra.mxu3 %v89_v44 }
  0x33   :  { %892 = vmatpush.bf16.msrb.mxu3 %v867_v4 }
  0x37   :  { %893 = vmatpush.bf16.msrb.mxu3 %v866_v5 }
  0x3b   :  { %894 = vmatpush.bf16.msrb.mxu3 %v865_v9 }
  0x3c   :  { %523 = vmatmul.bf16.gmra.mxu1 %v857_v30 }
  0x3f   :  { %895 = vmatpush.bf16.msrb.mxu3 %v864_v12 }
  0x42   :  { %188 = vmatmul.bf16.gmra.mxu0 %v84_v51  ;;  %548 = vmatmul.bf16.vlgmr.msrb.gmra.mxu3 %v862_v15 }
  0x43   :  { %896 = vmatpush.bf16.msra.mxu3 %v879_v6 }
  0x47   :  { %897 = vmatpush.bf16.msra.mxu3 %v878_v13 }
  0x4b   :  { %898 = vmatpush.bf16.msra.mxu3 %v877_v16 }
  0x4c   :  { %528 = vmatmul.bf16.gmra.mxu1 %v858_v39 }
  0x4f   :  { %899 = vmatpush.bf16.msra.mxu3 %v876_v17 }
  0x52   :  { %193 = vmatmul.bf16.gmra.mxu0 %v85_v57  ;;  %553 = vmatmul.bf16.gmra.mxu3 %v863_v20 }
  0x53   :  { %900 = vmatpush.bf16.msra.mxu3 %v875_v18 }
  0x57   :  { %901 = vmatpush.bf16.msra.mxu3 %v874_v19 }
  0x5b   :  { %902 = vmatpush.bf16.msra.mxu3 %v873_v21 }
  0x5c   :  { %533 = vmatmul.bf16.gmra.mxu1 %v859_v54 }
  0x5f   :  { %903 = vmatpush.bf16.msra.mxu3 %v872_v22  ;;  %v309_v26 = vpop.permute.xlu2 %308 }
  0x62   :  { %198 = vmatmul.bf16.gmra.mxu0 %v86_v3 }
  0x67   :  { %v314_v29 = vpop.permute.xlu2 %313 }
  0x6c   :  { %538 = vmatmul.bf16.gmra.mxu1 %v860_v2 }
  0x6f   :  { %v329_v34 = vpop.permute.xlu2 %328 }
  0x72   :  { %203 = vmatmul.bf16.gmra.mxu0 %v87_v14 }
  0x74   :  { %v289_v24 = vpop.permute.xlu0 %288 }
  0x76   :  { %v299_v25 = vpop.permute.xlu1 %298 }
  0x77   :  { %v354_v43 = vpop.permute.xlu2 %353 }
  0x7c   :  { %v294_v27 = vpop.permute.xlu0 %293  ;;  %543 = vmatmul.bf16.gmra.mxu1 %v861_v8 }
  0x7e   :  { %v304_v28 = vpop.permute.xlu1 %303 }
  0x7f   :  { %v359_v55 = vpop.permute.xlu2 %358 }
  0x84   :  { %v319_v31 = vpop.permute.xlu0 %318 }
  0x86   :  { %v324_v33 = vpop.permute.xlu1 %323 }
  0x8c   :  { %v334_v40 = vpop.permute.xlu0 %333 }
  0x8e   :  { %v349_v42 = vpop.permute.xlu1 %348 }
  0x95   :  { %v339_v49 = vpop.permute.xlu0 %338 }
  0x96   :  { %v344_v16 = vpop.permute.xlu1 %343 }
  0x9d   :  { %v364_v58 = vpop.permute.xlu0 %363 }
  0x9f   :  { %v179_v32 = vpop.f32.mrf.mxu0 }
  0xa0   :  { %v366_v37 = vmul.f32 %v289_v24, %v179_v32 }
  0xa5   :  { %v209_v35 = vpop.f32.mrf.mxu3 }
  0xa6   :  { %v378_v44 = vmul.f32 %v349_v42, %v209_v35 }
  0xa7   :  { %v181_v36 = vpop.f32.mrf.mxu0 }
  0xa8   :  { %v367_v38 = vmul.f32 %v294_v27, %v181_v36 }
  0xa9   :  { %v519_v23 = vpop.f32.mrf.mxu1 }
  0xaa   :  { %v559_v41 = vpack.c.bf16 %v367_v38, %v366_v37 }
  0xac   :  { %639 = vmatmul.bf16.vlgmr.msra.gmra.mxu2 %v559_v41 }
  0xad   :  { %v211_v45 = vpop.f32.mrf.mxu3 }
  0xae   :  { %v379_v46 = vmul.f32 %v354_v43, %v211_v45 }
  0xaf   :  { %v184_v47 = vpop.f32.mrf.mxu0 }
  0xb0   :  { %v565_v48 = vpack.c.bf16 %v379_v46, %v378_v44  ;;  %v368_v52 = vmul.f32 %v299_v25, %v184_v47 }
  0xb1   :  { %v521_v25 = vpop.f32.mrf.mxu1 }
  0xb2   :  { %669 = vmatmul.bf16.vlgmr.msra.gmra.mxu3 %v565_v48 }
  0xb5   :  { %v214_v50 = vpop.f32.mrf.mxu3 }
  0xb6   :  { %v380_v57 = vmul.f32 %v359_v55, %v214_v50 }
  0xb7   :  { %v186_v51 = vpop.f32.mrf.mxu0 }
  0xb8   :  { %v369_v53 = vmul.f32 %v304_v28, %v186_v51  ;;  %v1109_v28 = vld [vmem:[%s1181_s6] ss:$0 sm:$0xff] }
  0xb9   :  { %v524_v27 = vpop.f32.mrf.mxu1 }
  0xba   :  { %v560_v56 = vpack.c.bf16 %v369_v53, %v368_v52 }
  0xbc   :  { %644 = vmatmul.bf16.gmra.mxu2 %v560_v56 }
  0xbd   :  { %v216_v59 = vpop.f32.mrf.mxu3 }
  0xbe   :  { %v381_v60 = vmul.f32 %v364_v58, %v216_v59 }
  0xbf   :  { %v189_v61 = vpop.f32.mrf.mxu0 }
  0xc0   :  { %v566_v62 = vpack.c.bf16 %v381_v60, %v380_v57  ;;  %v370_v0 = vmul.f32 %v309_v26, %v189_v61 }
  0xc1   :  { %v526_v35 = vpop.f32.mrf.mxu1 }
  0xc2   :  { %674 = vmatmul.bf16.gmra.mxu3 %v566_v62 }
  0xc5   :  { %v549_v21 = vpop.f32.mrf.mxu3 }
  0xc7   :  { %v191_v63 = vpop.f32.mrf.mxu0 }
  0xc8   :  { %v371_v1 = vmul.f32 %v314_v29, %v191_v63 }
  0xc9   :  { %v529_v44 = vpop.f32.mrf.mxu1 }
  0xca   :  { %v561_v3 = vpack.c.bf16 %v371_v1, %v370_v0 }
  0xcc   :  { %649 = vmatmul.bf16.gmra.mxu2 %v561_v3 }
  0xcd   :  { %v551_v22 = vpop.f32.mrf.mxu3 }
  0xcf   :  { %v194_v4 = vpop.f32.mrf.mxu0 }
  0xd0   :  { %v372_v6 = vmul.f32 %v319_v31, %v194_v4 }
  0xd1   :  { %v531_v52 = vpop.f32.mrf.mxu1 }
  0xd5   :  { %v554_v24 = vpop.f32.mrf.mxu3 }
  0xd7   :  { %v196_v5 = vpop.f32.mrf.mxu0 }
  0xd8   :  { %v373_v7 = vmul.f32 %v324_v33, %v196_v5 }
  0xd9   :  { %v534_v59 = vpop.f32.mrf.mxu1 }
  0xda   :  { %v562_v9 = vpack.c.bf16 %v373_v7, %v372_v6 }
  0xdc   :  { %654 = vmatmul.bf16.gmra.mxu2 %v562_v9 }
  0xdd   :  { %v556_v26 = vpop.f32.mrf.mxu3 }
  0xdf   :  { %v199_v10 = vpop.f32.mrf.mxu0 }
  0xe0   :  { %v374_v12 = vmul.f32 %v329_v34, %v199_v10 }
  0xe1   :  { %v536_v63 = vpop.f32.mrf.mxu1 }
  0xe7   :  { %v201_v11 = vpop.f32.mrf.mxu0 }
  0xe8   :  { %v375_v13 = vmul.f32 %v334_v40, %v201_v11 }
  0xe9   :  { %v539_v5 = vpop.f32.mrf.mxu1 }
  0xea   :  { %v563_v14 = vpack.c.bf16 %v375_v13, %v374_v12 }
  0xec   :  { %659 = vmatmul.bf16.gmra.mxu2 %v563_v14 }
  0xef   :  { %v204_v15 = vpop.f32.mrf.mxu0 }
  0xf0   :  { %v376_v18 = vmul.f32 %v339_v49, %v204_v15 }
  0xf1   :  { %v541_v10 = vpop.f32.mrf.mxu1 }
  0xf7   :  { %v206_v17 = vpop.f32.mrf.mxu0 }
  0xf8   :  { %v377_v19 = vmul.f32 %v344_v16, %v206_v17 }
  0xf9   :  { %v544_v14 = vpop.f32.mrf.mxu1 }
  0xfa   :  { %v564_v20 = vpack.c.bf16 %v377_v19, %v376_v18 }
  0xfc   :  { %664 = vmatmul.bf16.gmra.mxu2 %v564_v20 }
 0x101   :  { %v546_v18 = vpop.f32.mrf.mxu1 }
 0x12f   :  { %v640_v29 = vpop.f32.mrf.mxu2 }
 0x130   :  { %v641_v30 = vadd.f32 %v640_v29, %v519_v23 }
 0x132   :  { %v684_v31 = vadd.f32 %v1109_v28, %v641_v30 }
 0x134   :  { %700 = vst [vmem:[%s1182_s7] sm:$0xff] %v684_v31 }
 0x135   :  { %v670_v32 = vpop.f32.mrf.mxu3 }
 0x136   :  { %v671_v33 = vadd.f32 %v670_v32, %v549_v21 }
 0x137   :  { %v642_v34 = vpop.f32.mrf.mxu2 }
 0x138   :  { %v696_v36 = vadd.f32 %v1109_v28, %v671_v33  ;;  %v643_v37 = vadd.f32 %v642_v34, %v521_v25 }
 0x13a   :  { %712 = vst [vmem:[%s1182_s7 + $0x60] sm:$0xff] %v696_v36  ;;  %v685_v38 = vadd.f32 %v1109_v28, %v643_v37 }
 0x13c   :  { %701 = vst [vmem:[%s1182_s7 + $0x8] sm:$0xff] %v685_v38 }
 0x13d   :  { %v672_v39 = vpop.f32.mrf.mxu3 }
 0x13e   :  { %v673_v40 = vadd.f32 %v672_v39, %v551_v22 }
 0x13f   :  { %v645_v41 = vpop.f32.mrf.mxu2 }
 0x140   :  { %v697_v42 = vadd.f32 %v1109_v28, %v673_v40  ;;  %v646_v43 = vadd.f32 %v645_v41, %v524_v27 }
 0x142   :  { %713 = vst [vmem:[%s1182_s7 + $0x68] sm:$0xff] %v697_v42  ;;  %v686_v45 = vadd.f32 %v1109_v28, %v646_v43 }
 0x144   :  { %702 = vst [vmem:[%s1182_s7 + $0x10] sm:$0xff] %v686_v45 }
 0x145   :  { %v675_v46 = vpop.f32.mrf.mxu3 }
 0x146   :  { %v676_v47 = vadd.f32 %v675_v46, %v554_v24 }
 0x147   :  { %v647_v48 = vpop.f32.mrf.mxu2 }
 0x148   :  { %v698_v49 = vadd.f32 %v1109_v28, %v676_v47  ;;  %v648_v50 = vadd.f32 %v647_v48, %v526_v35 }
 0x14a   :  { %714 = vst [vmem:[%s1182_s7 + $0x70] sm:$0xff] %v698_v49  ;;  %v687_v51 = vadd.f32 %v1109_v28, %v648_v50 }
 0x14c   :  { %703 = vst [vmem:[%s1182_s7 + $0x18] sm:$0xff] %v687_v51 }
 0x14d   :  { %v677_v53 = vpop.f32.mrf.mxu3 }
 0x14e   :  { %v678_v54 = vadd.f32 %v677_v53, %v556_v26 }
 0x14f   :  { %v650_v55 = vpop.f32.mrf.mxu2 }
 0x150   :  { %v699_v56 = vadd.f32 %v1109_v28, %v678_v54  ;;  %v651_v57 = vadd.f32 %v650_v55, %v529_v44 }
 0x152   :  { %715 = vst [vmem:[%s1182_s7 + $0x78] sm:$0xff] %v699_v56  ;;  %v688_v58 = vadd.f32 %v1109_v28, %v651_v57 }
 0x154   :  { %704 = vst [vmem:[%s1182_s7 + $0x20] sm:$0xff] %v688_v58 }
 0x157   :  { %v652_v60 = vpop.f32.mrf.mxu2 }
 0x158   :  { %v653_v61 = vadd.f32 %v652_v60, %v531_v52 }
 0x15a   :  { %v689_v62 = vadd.f32 %v1109_v28, %v653_v61 }
 0x15c   :  { %705 = vst [vmem:[%s1182_s7 + $0x28] sm:$0xff] %v689_v62 }
 0x15f   :  { %v655_v0 = vpop.f32.mrf.mxu2 }
 0x160   :  { %v656_v1 = vadd.f32 %v655_v0, %v534_v59 }
 0x162   :  { %v690_v2 = vadd.f32 %v1109_v28, %v656_v1 }
 0x164   :  { %706 = vst [vmem:[%s1182_s7 + $0x30] sm:$0xff] %v690_v2 }
 0x167   :  { %v657_v3 = vpop.f32.mrf.mxu2 }
 0x168   :  { %v658_v4 = vadd.f32 %v657_v3, %v536_v63 }
 0x16a   :  { %v691_v6 = vadd.f32 %v1109_v28, %v658_v4 }
 0x16c   :  { %707 = vst [vmem:[%s1182_s7 + $0x38] sm:$0xff] %v691_v6 }
 0x16f   :  { %v660_v7 = vpop.f32.mrf.mxu2 }
 0x170   :  { %v661_v8 = vadd.f32 %v660_v7, %v539_v5 }
 0x172   :  { %v692_v9 = vadd.f32 %v1109_v28, %v661_v8 }
 0x174   :  { %708 = vst [vmem:[%s1182_s7 + $0x40] sm:$0xff] %v692_v9 }
 0x177   :  { %v662_v11 = vpop.f32.mrf.mxu2 }
 0x178   :  { %v663_v12 = vadd.f32 %v662_v11, %v541_v10 }
 0x17a   :  { %v693_v13 = vadd.f32 %v1109_v28, %v663_v12 }
 0x17c   :  { %709 = vst [vmem:[%s1182_s7 + $0x48] sm:$0xff] %v693_v13 }
 0x17f   :  { %v665_v15 = vpop.f32.mrf.mxu2 }
 0x180   :  { %v666_v16 = vadd.f32 %v665_v15, %v544_v14 }
 0x182   :  { %v694_v17 = vadd.f32 %v1109_v28, %v666_v16 }
 0x184   :  { %710 = vst [vmem:[%s1182_s7 + $0x50] sm:$0xff] %v694_v17 }
 0x187   :  { %v667_v19 = vpop.f32.mrf.mxu2 }
 0x188   :  { %v668_v20 = vadd.f32 %v667_v19, %v546_v18 }
 0x18a   :  { %v695_v21 = vadd.f32 %v1109_v28, %v668_v20 }
 0x18c   :  { %711 = vst [vmem:[%s1182_s7 + $0x58] sm:$0xff] %v695_v21 }

// kernel: gnn_forward.2
= control target key start
LH: loop header
LB: loop body
LE: loop exit
PB: predicated region body
PF: predicated region fallthrough
CT: control target
= control target key end

     0   :  { %v988_v1 = vmov 0   ;;  %s1230_s1 = inlined_call_operand.vmem [shape: bf16[128,128], index: 1, kind: input, shape index: {}, may-alias: {1,2}]   ;;  %s1231_s5 = inlined_call_operand.vmem [shape: f32[128,1], index: 5, kind: input, shape index: {}]   ;;  %s1232_s0 = inlined_call_operand.vmem [shape: s8[128,128], index: 0, kind: input, shape index: {}]   ;;  %s1233_s4 = inlined_call_operand.vmem [shape: bf16[128,128], index: 4, kind: input, shape index: {}]   ;;  %s1234_s3 = inlined_call_operand.vmem [shape: bf16[128,128], index: 3, kind: input, shape index: {}]   ;;  %s1235_s2 = inlined_call_operand.vmem [shape: bf16[128,128], index: 2, kind: input, shape index: {}, may-alias: {1,2}]   ;;  %s1236_s6 = inlined_call_operand.vmem [shape: f32[1,128], index: 6, kind: input, shape index: {}]   ;;  %s1237_s7 = inlined_call_operand.vmem [shape: bf16[128,128], index: 7, kind: output, shape index: {}]  }
   0x1   :  { %v887_v0 = vld [vmem:[%s1230_s1 + $0x38] sm:$0xff]  ;;  %984 = vset.pattern.permute.xlu0 %v988_v1  ;;  %v270_v2 = vld [vmem:[%s1231_s5] sm:$0xff]  ;;  %985 = vset.pattern.permute.xlu1 %v988_v1  ;;  %v886_v3 = vld [vmem:[%s1230_s1 + $0x30] sm:$0xff] }
   0x2   :  { %288 = vperm.xlu0 %984, %v270_v2   ;;  %986 = vset.pattern.permute.xlu2 %v988_v1  ;;  %v272_v4 = vld [vmem:[%s1231_s5 + $0x10] sm:$0xff]  ;;  %v885_v5 = vld [vmem:[%s1230_s1 + $0x28] sm:$0xff]  ;;  %v273_v7 = vld [vmem:[%s1231_s5 + $0x18] sm:$0xff] }
   0x3   :  { %170 = vmatpush.bf16.msra.mxu0 %v887_v0  ;;  %959 = vmatpush.bf16.msra.mxu3 %v887_v0  ;;  %v271_v6 = vld [vmem:[%s1231_s5 + $0x8] sm:$0xff]  ;;  %v884_v8 = vld [vmem:[%s1230_s1 + $0x20] sm:$0xff]  ;;  %v883_v9 = vld [vmem:[%s1230_s1 + $0x18] sm:$0xff] }
   0x4   :  { %298 = vperm.xlu1 %985, %v272_v4   ;;  %v276_v10 = vld [vmem:[%s1231_s5 + $0x30] sm:$0xff]  ;;  %v277_v11 = vld [vmem:[%s1231_s5 + $0x38] sm:$0xff]  ;;  %v274_v12 = vld [vmem:[%s1231_s5 + $0x20] sm:$0xff] }
   0x5   :  { %v882_v13 = vld [vmem:[%s1230_s1 + $0x10] sm:$0xff]  ;;  %v46_v14 = vld [vmem:[%s1232_s0] sm:$0xff]  ;;  %v49_v15 = vld [vmem:[%s1232_s0 + $0x18] sm:$0xff]  ;;  %308 = vperm.xlu2 %986, %v274_v12  }
   0x6   :  { %v50_v16 = vunpack.c.0.s8 %v46_v14  ;;  %v51_v17 = vunpack.c.1.s8 %v46_v14  ;;  %v62_v18 = vunpack.c.0.s8 %v49_v15  ;;  %v63_v19 = vunpack.c.1.s8 %v49_v15  ;;  %v881_v20 = vld [vmem:[%s1230_s1 + $0x8] sm:$0xff]  ;;  %v282_v26 = vld [vmem:[%s1231_s5 + $0x60] sm:$0xff]  ;;  %v280_v30 = vld [vmem:[%s1231_s5 + $0x50] sm:$0xff] }
   0x7   :  { %171 = vmatpush.bf16.msra.mxu0 %v886_v3  ;;  %960 = vmatpush.bf16.msra.mxu3 %v886_v3  ;;  %v279_v21 = vld [vmem:[%s1231_s5 + $0x48] sm:$0xff]  ;;  %v880_v27 = vld [vmem:[%s1230_s1] sm:$0xff]  ;;  %v281_v31 = vld [vmem:[%s1231_s5 + $0x58] sm:$0xff]  ;;  %v52_v33 = vunpack.c.2.s8 %v46_v14  ;;  %v53_v34 = vunpack.c.3.s8 %v46_v14  ;;  %v64_v35 = vunpack.c.2.s8 %v49_v15  ;;  %v65_v36 = vunpack.c.3.s8 %v49_v15 }
   0x8   :  { %v66_v22 = vcvt.s32.f32 %v50_v16  ;;  %v67_v23 = vcvt.s32.f32 %v51_v17  ;;  %v78_v24 = vcvt.s32.f32 %v62_v18  ;;  %v79_v25 = vcvt.s32.f32 %v63_v19  ;;  %v275_v32 = vld [vmem:[%s1231_s5 + $0x28] sm:$0xff]  ;;  %v285_v37 = vld [vmem:[%s1231_s5 + $0x78] sm:$0xff]  ;;  %v278_v38 = vld [vmem:[%s1231_s5 + $0x40] sm:$0xff] }
   0x9   :  { %v68_v39 = vcvt.s32.f32 %v52_v33  ;;  %v69_v40 = vcvt.s32.f32 %v53_v34  ;;  %v80_v41 = vcvt.s32.f32 %v64_v35  ;;  %v81_v42 = vcvt.s32.f32 %v65_v36  ;;  %v283_v45 = vld [vmem:[%s1231_s5 + $0x68] sm:$0xff]  ;;  %v284_v52 = vld [vmem:[%s1231_s5 + $0x70] sm:$0xff]  ;;  %v903_v58 = vld [vmem:[%s1233_s4 + $0x38] sm:$0xff] }
   0xa   :  { %293 = vperm.xlu0 %984, %v271_v6   ;;  %v82_v28 = vpack.c.bf16 %v67_v23, %v66_v22  ;;  %v88_v29 = vpack.c.bf16 %v79_v25, %v78_v24  ;;  %v47_v46 = vld [vmem:[%s1232_s0 + $0x8] sm:$0xff]  ;;  %v48_v59 = vld [vmem:[%s1232_s0 + $0x10] sm:$0xff]  ;;  %510 = vmatpush.bf16.msra.mxu1 %v903_v58  ;;  %v900_v2 = vld [vmem:[%s1233_s4 + $0x20] sm:$0xff] }
   0xb   :  { %172 = vmatpush.bf16.msra.mxu0 %v885_v5  ;;  %961 = vmatpush.bf16.msra.mxu3 %v885_v5  ;;  %v83_v43 = vpack.c.bf16 %v69_v40, %v68_v39  ;;  %v89_v44 = vpack.c.bf16 %v81_v42, %v80_v41  ;;  %v54_v47 = vunpack.c.0.s8 %v47_v46  ;;  %v55_v48 = vunpack.c.1.s8 %v47_v46  ;;  %v902_v60 = vld [vmem:[%s1233_s4 + $0x30] sm:$0xff]  ;;  %v901_v63 = vld [vmem:[%s1233_s4 + $0x28] sm:$0xff]  ;;  %v899_v4 = vld [vmem:[%s1233_s4 + $0x18] sm:$0xff] }
   0xc   :  { %303 = vperm.xlu1 %985, %v273_v7   ;;  %v56_v53 = vunpack.c.2.s8 %v47_v46  ;;  %v57_v54 = vunpack.c.3.s8 %v47_v46  ;;  %v58_v61 = vunpack.c.0.s8 %v48_v59  ;;  %v59_v62 = vunpack.c.1.s8 %v48_v59  ;;  %v898_v5 = vld [vmem:[%s1233_s4 + $0x10] sm:$0xff]  ;;  %v911_v6 = vld [vmem:[%s1234_s3 + $0x38] sm:$0xff]  ;;  %v896_v12 = vld [vmem:[%s1233_s4] sm:$0xff] }
   0xd   :  { %313 = vperm.xlu2 %986, %v275_v32   ;;  %v70_v49 = vcvt.s32.f32 %v54_v47  ;;  %v71_v50 = vcvt.s32.f32 %v55_v48  ;;  %v60_v7 = vunpack.c.2.s8 %v48_v59  ;;  %631 = vmatpush.bf16.msra.mxu2 %v911_v6  ;;  %v894_v15 = vld [vmem:[%s1235_s2 + $0x30] sm:$0xff]  ;;  %v909_v16 = vld [vmem:[%s1234_s3 + $0x28] sm:$0xff]  ;;  %v908_v17 = vld [vmem:[%s1234_s3 + $0x20] sm:$0xff] }
   0xe   :  { %v72_v55 = vcvt.s32.f32 %v56_v53  ;;  %v73_v56 = vcvt.s32.f32 %v57_v54  ;;  %511 = vmatpush.bf16.msra.mxu1 %v902_v60  ;;  %v74_v0 = vcvt.s32.f32 %v58_v61  ;;  %v75_v1 = vcvt.s32.f32 %v59_v62  ;;  %v907_v18 = vld [vmem:[%s1234_s3 + $0x18] sm:$0xff]  ;;  %v906_v19 = vld [vmem:[%s1234_s3 + $0x10] sm:$0xff]  ;;  %v904_v22 = vld [vmem:[%s1234_s3] sm:$0xff] }
   0xf   :  { %173 = vmatpush.bf16.msra.mxu0 %v884_v8  ;;  %962 = vmatpush.bf16.msra.mxu3 %v884_v8  ;;  %v84_v51 = vpack.c.bf16 %v71_v50, %v70_v49  ;;  %v61_v8 = vunpack.c.3.s8 %v48_v59  ;;  %v888_v23 = vld [vmem:[%s1235_s2] sm:$0xff]  ;;  %v890_v39 = vld [vmem:[%s1235_s2 + $0x10] sm:$0xff]  ;;  %v891_v54 = vld [vmem:[%s1235_s2 + $0x18] sm:$0xff] }
  0x10   :  { %v85_v57 = vpack.c.bf16 %v73_v56, %v72_v55  ;;  %v86_v3 = vpack.c.bf16 %v75_v1, %v74_v0 }
  0x12   :  { %318 = vperm.xlu0 %984, %v276_v10   ;;  %512 = vmatpush.bf16.msra.mxu1 %v901_v63  ;;  %v76_v10 = vcvt.s32.f32 %v60_v7 }
  0x13   :  { %174 = vmatpush.bf16.msra.mxu0 %v883_v9  ;;  %963 = vmatpush.bf16.msra.mxu3 %v883_v9  ;;  %v897_v9 = vld [vmem:[%s1233_s4 + $0x8] sm:$0xff] }
  0x14   :  { %323 = vperm.xlu1 %985, %v277_v11   ;;  %v77_v11 = vcvt.s32.f32 %v61_v8  ;;  %v893_v8 = vld [vmem:[%s1235_s2 + $0x28] sm:$0xff] }
  0x15   :  { %328 = vperm.xlu2 %986, %v278_v38  }
  0x16   :  { %513 = vmatpush.bf16.msra.mxu1 %v900_v2  ;;  %v87_v14 = vpack.c.bf16 %v77_v11, %v76_v10 }
  0x17   :  { %175 = vmatpush.bf16.msra.mxu0 %v882_v13  ;;  %964 = vmatpush.bf16.msra.mxu3 %v882_v13  ;;  %v910_v13 = vld [vmem:[%s1234_s3 + $0x30] sm:$0xff] }
  0x18   :  { %632 = vmatpush.bf16.msra.mxu2 %v910_v13 }
  0x1a   :  { %333 = vperm.xlu0 %984, %v279_v21   ;;  %514 = vmatpush.bf16.msra.mxu1 %v899_v4  ;;  %v905_v21 = vld [vmem:[%s1234_s3 + $0x8] sm:$0xff] }
  0x1b   :  { %176 = vmatpush.bf16.msra.mxu0 %v881_v20  ;;  %965 = vmatpush.bf16.msra.mxu3 %v881_v20  ;;  %v895_v20 = vld [vmem:[%s1235_s2 + $0x38] sm:$0xff] }
  0x1c   :  { %348 = vperm.xlu1 %985, %v282_v26   ;;  %633 = vmatpush.bf16.msra.mxu2 %v909_v16 }
  0x1d   :  { %353 = vperm.xlu2 %986, %v283_v45  }
  0x1e   :  { %515 = vmatpush.bf16.msra.mxu1 %v898_v5 }
  0x1f   :  { %177 = vmatpush.bf16.msra.mxu0 %v880_v27  ;;  %966 = vmatpush.bf16.msra.mxu3 %v880_v27 }
  0x20   :  { %634 = vmatpush.bf16.msra.mxu2 %v908_v17 }
  0x22   :  { %178 = vmatmul.bf16.vlgmr.msra.gmra.mxu0 %v82_v28  ;;  %208 = vmatmul.bf16.vlgmr.msra.gmra.mxu3 %v88_v29 }
  0x23   :  { %338 = vperm.xlu0 %984, %v280_v30   ;;  %967 = vmatpush.bf16.msrb.mxu3 %v903_v58  ;;  %v889_v30 = vld [vmem:[%s1235_s2 + $0x8] sm:$0xff] }
  0x24   :  { %343 = vperm.xlu1 %985, %v281_v31   ;;  %516 = vmatpush.bf16.msra.mxu1 %v897_v9 }
  0x25   :  { %358 = vperm.xlu2 %986, %v284_v52   ;;  %635 = vmatpush.bf16.msra.mxu2 %v907_v18 }
  0x27   :  { %968 = vmatpush.bf16.msrb.mxu3 %v902_v60 }
  0x28   :  { %517 = vmatpush.bf16.msra.mxu1 %v896_v12 }
  0x29   :  { %636 = vmatpush.bf16.msra.mxu2 %v906_v19 }
  0x2b   :  { %363 = vperm.xlu0 %984, %v285_v37   ;;  %969 = vmatpush.bf16.msrb.mxu3 %v901_v63 }
  0x2c   :  { %518 = vmatmul.bf16.vlgmr.msra.gmra.mxu1 %v888_v23 }
  0x2d   :  { %637 = vmatpush.bf16.msra.mxu2 %v905_v21 }
  0x2f   :  { %970 = vmatpush.bf16.msrb.mxu3 %v900_v2  ;;  %v892_v2 = vld [vmem:[%s1235_s2 + $0x20] sm:$0xff] }
  0x31   :  { %638 = vmatpush.bf16.msra.mxu2 %v904_v22 }
  0x32   :  { %183 = vmatmul.bf16.gmra.mxu0 %v83_v43  ;;  %213 = vmatmul.bf16.gmra.mxu3 %v89_v44 }
  0x33   :  { %971 = vmatpush.bf16.msrb.mxu3 %v899_v4 }
  0x37   :  { %972 = vmatpush.bf16.msrb.mxu3 %v898_v5 }
  0x3b   :  { %973 = vmatpush.bf16.msrb.mxu3 %v897_v9 }
  0x3c   :  { %523 = vmatmul.bf16.gmra.mxu1 %v889_v30  ;;  %v1188_v30 = vld [vmem:[%s1236_s6] ss:$0 sm:$0xff] }
  0x3f   :  { %974 = vmatpush.bf16.msrb.mxu3 %v896_v12 }
  0x42   :  { %188 = vmatmul.bf16.gmra.mxu0 %v84_v51  ;;  %548 = vmatmul.bf16.vlgmr.msrb.gmra.mxu3 %v894_v15 }
  0x43   :  { %975 = vmatpush.bf16.msra.mxu3 %v911_v6 }
  0x47   :  { %976 = vmatpush.bf16.msra.mxu3 %v910_v13 }
  0x4b   :  { %977 = vmatpush.bf16.msra.mxu3 %v909_v16 }
  0x4c   :  { %528 = vmatmul.bf16.gmra.mxu1 %v890_v39 }
  0x4f   :  { %978 = vmatpush.bf16.msra.mxu3 %v908_v17 }
  0x52   :  { %193 = vmatmul.bf16.gmra.mxu0 %v85_v57  ;;  %553 = vmatmul.bf16.gmra.mxu3 %v895_v20 }
  0x53   :  { %979 = vmatpush.bf16.msra.mxu3 %v907_v18 }
  0x57   :  { %980 = vmatpush.bf16.msra.mxu3 %v906_v19 }
  0x5b   :  { %981 = vmatpush.bf16.msra.mxu3 %v905_v21 }
  0x5c   :  { %533 = vmatmul.bf16.gmra.mxu1 %v891_v54 }
  0x5f   :  { %982 = vmatpush.bf16.msra.mxu3 %v904_v22  ;;  %v309_v26 = vpop.permute.xlu2 %308 }
  0x62   :  { %198 = vmatmul.bf16.gmra.mxu0 %v86_v3 }
  0x67   :  { %v314_v29 = vpop.permute.xlu2 %313 }
  0x6c   :  { %538 = vmatmul.bf16.gmra.mxu1 %v892_v2 }
  0x6f   :  { %v329_v34 = vpop.permute.xlu2 %328 }
  0x72   :  { %203 = vmatmul.bf16.gmra.mxu0 %v87_v14 }
  0x74   :  { %v289_v24 = vpop.permute.xlu0 %288 }
  0x76   :  { %v299_v25 = vpop.permute.xlu1 %298 }
  0x77   :  { %v354_v43 = vpop.permute.xlu2 %353 }
  0x7c   :  { %v294_v27 = vpop.permute.xlu0 %293  ;;  %543 = vmatmul.bf16.gmra.mxu1 %v893_v8 }
  0x7e   :  { %v304_v28 = vpop.permute.xlu1 %303 }
  0x7f   :  { %v359_v55 = vpop.permute.xlu2 %358 }
  0x84   :  { %v319_v31 = vpop.permute.xlu0 %318 }
  0x86   :  { %v324_v33 = vpop.permute.xlu1 %323 }
  0x8c   :  { %v334_v40 = vpop.permute.xlu0 %333 }
  0x8e   :  { %v349_v42 = vpop.permute.xlu1 %348 }
  0x95   :  { %v339_v49 = vpop.permute.xlu0 %338 }
  0x96   :  { %v344_v16 = vpop.permute.xlu1 %343 }
  0x9d   :  { %v364_v58 = vpop.permute.xlu0 %363 }
  0x9f   :  { %v179_v32 = vpop.f32.mrf.mxu0 }
  0xa0   :  { %v366_v37 = vmul.f32 %v289_v24, %v179_v32 }
  0xa5   :  { %v209_v35 = vpop.f32.mrf.mxu3 }
  0xa6   :  { %v378_v44 = vmul.f32 %v349_v42, %v209_v35 }
  0xa7   :  { %v181_v36 = vpop.f32.mrf.mxu0 }
  0xa8   :  { %v367_v38 = vmul.f32 %v294_v27, %v181_v36 }
  0xa9   :  { %v519_v23 = vpop.f32.mrf.mxu1 }
  0xaa   :  { %v559_v41 = vpack.c.bf16 %v367_v38, %v366_v37 }
  0xac   :  { %639 = vmatmul.bf16.vlgmr.msra.gmra.mxu2 %v559_v41 }
  0xad   :  { %v211_v45 = vpop.f32.mrf.mxu3 }
  0xae   :  { %v379_v46 = vmul.f32 %v354_v43, %v211_v45 }
  0xaf   :  { %v184_v47 = vpop.f32.mrf.mxu0 }
  0xb0   :  { %v565_v48 = vpack.c.bf16 %v379_v46, %v378_v44  ;;  %v368_v52 = vmul.f32 %v299_v25, %v184_v47 }
  0xb1   :  { %v521_v25 = vpop.f32.mrf.mxu1 }
  0xb2   :  { %669 = vmatmul.bf16.vlgmr.msra.gmra.mxu3 %v565_v48 }
  0xb5   :  { %v214_v50 = vpop.f32.mrf.mxu3 }
  0xb6   :  { %v380_v57 = vmul.f32 %v359_v55, %v214_v50 }
  0xb7   :  { %v186_v51 = vpop.f32.mrf.mxu0 }
  0xb8   :  { %v369_v53 = vmul.f32 %v304_v28, %v186_v51 }
  0xb9   :  { %v524_v27 = vpop.f32.mrf.mxu1 }
  0xba   :  { %v560_v56 = vpack.c.bf16 %v369_v53, %v368_v52 }
  0xbc   :  { %644 = vmatmul.bf16.gmra.mxu2 %v560_v56 }
  0xbd   :  { %v216_v59 = vpop.f32.mrf.mxu3 }
  0xbe   :  { %v381_v60 = vmul.f32 %v364_v58, %v216_v59 }
  0xbf   :  { %v189_v61 = vpop.f32.mrf.mxu0 }
  0xc0   :  { %v566_v62 = vpack.c.bf16 %v381_v60, %v380_v57  ;;  %v370_v0 = vmul.f32 %v309_v26, %v189_v61 }
  0xc2   :  { %674 = vmatmul.bf16.gmra.mxu3 %v566_v62 }
  0xc5   :  { %v549_v21 = vpop.f32.mrf.mxu3 }
  0xc7   :  { %v191_v63 = vpop.f32.mrf.mxu0 }
  0xc8   :  { %v371_v1 = vmul.f32 %v314_v29, %v191_v63 }
  0xca   :  { %v561_v3 = vpack.c.bf16 %v371_v1, %v370_v0 }
  0xcc   :  { %649 = vmatmul.bf16.gmra.mxu2 %v561_v3 }
  0xcd   :  { %v551_v22 = vpop.f32.mrf.mxu3 }
  0xcf   :  { %v194_v4 = vpop.f32.mrf.mxu0 }
  0xd0   :  { %v372_v6 = vmul.f32 %v319_v31, %v194_v4 }
  0xd5   :  { %v554_v24 = vpop.f32.mrf.mxu3 }
  0xd7   :  { %v196_v5 = vpop.f32.mrf.mxu0 }
  0xd8   :  { %v373_v7 = vmul.f32 %v324_v33, %v196_v5  ;;  %v526_v33 = vpop.f32.mrf.mxu1 }
  0xda   :  { %v562_v9 = vpack.c.bf16 %v373_v7, %v372_v6 }
  0xdc   :  { %654 = vmatmul.bf16.gmra.mxu2 %v562_v9 }
  0xdd   :  { %v556_v26 = vpop.f32.mrf.mxu3 }
  0xdf   :  { %v199_v10 = vpop.f32.mrf.mxu0 }
  0xe0   :  { %v374_v12 = vmul.f32 %v329_v34, %v199_v10  ;;  %v529_v46 = vpop.f32.mrf.mxu1 }
  0xe7   :  { %v201_v11 = vpop.f32.mrf.mxu0 }
  0xe8   :  { %v375_v13 = vmul.f32 %v334_v40, %v201_v11  ;;  %v531_v57 = vpop.f32.mrf.mxu1 }
  0xea   :  { %v563_v14 = vpack.c.bf16 %v375_v13, %v374_v12 }
  0xec   :  { %659 = vmatmul.bf16.gmra.mxu2 %v563_v14 }
  0xef   :  { %v204_v15 = vpop.f32.mrf.mxu0 }
  0xf0   :  { %v376_v18 = vmul.f32 %v339_v49, %v204_v15  ;;  %v534_v6 = vpop.f32.mrf.mxu1 }
  0xf7   :  { %v206_v17 = vpop.f32.mrf.mxu0 }
  0xf8   :  { %v377_v19 = vmul.f32 %v344_v16, %v206_v17  ;;  %v536_v14 = vpop.f32.mrf.mxu1 }
  0xfa   :  { %v564_v20 = vpack.c.bf16 %v377_v19, %v376_v18 }
  0xfc   :  { %664 = vmatmul.bf16.gmra.mxu2 %v564_v20 }
 0x100   :  { %v539_v20 = vpop.f32.mrf.mxu1 }
 0x12f   :  { %v640_v28 = vpop.f32.mrf.mxu2 }
 0x130   :  { %v641_v29 = vadd.f32 %v640_v28, %v519_v23 }
 0x132   :  { %v684_v34 = vadd.f32 %v1188_v30, %v641_v29 }
 0x134   :  { %v700_v38 = vmax.f32 %v684_v34, 0.0 }
 0x135   :  { %v670_v31 = vpop.f32.mrf.mxu3 }
 0x136   :  { %v671_v36 = vadd.f32 %v670_v31, %v549_v21 }
 0x137   :  { %v642_v32 = vpop.f32.mrf.mxu2 }
 0x138   :  { %v643_v35 = vadd.f32 %v642_v32, %v521_v25  ;;  %v696_v41 = vadd.f32 %v1188_v30, %v671_v36 }
 0x13a   :  { %v685_v37 = vadd.f32 %v1188_v30, %v643_v35  ;;  %v712_v47 = vmax.f32 %v696_v41, 0.0 }
 0x13c   :  { %v701_v39 = vmax.f32 %v685_v37, 0.0 }
 0x13d   :  { %v672_v40 = vpop.f32.mrf.mxu3 }
 0x13e   :  { %v915_v42 = vpack.c.bf16 %v701_v39, %v700_v38  ;;  %v673_v43 = vadd.f32 %v672_v40, %v551_v22 }
 0x13f   :  { %v645_v44 = vpop.f32.mrf.mxu2 }
 0x140   :  { %916 = vst [vmem:[%s1237_s7] sm:$0xff] %v915_v42   ;;  %v697_v45 = vadd.f32 %v1188_v30, %v673_v43  ;;  %v646_v50 = vadd.f32 %v645_v44, %v524_v27 }
 0x142   :  { %v713_v48 = vmax.f32 %v697_v45, 0.0  ;;  %v686_v53 = vadd.f32 %v1188_v30, %v646_v50 }
 0x144   :  { %v945_v49 = vpack.c.bf16 %v713_v48, %v712_v47  ;;  %v702_v58 = vmax.f32 %v686_v53, 0.0 }
 0x145   :  { %v675_v51 = vpop.f32.mrf.mxu3 }
 0x146   :  { %957 = vst [vmem:[%s1237_s7 + $0x30] sm:$0xff] %v945_v49   ;;  %v676_v55 = vadd.f32 %v675_v51, %v554_v24 }
 0x147   :  { %v647_v52 = vpop.f32.mrf.mxu2 }
 0x148   :  { %v648_v54 = vadd.f32 %v647_v52, %v526_v33  ;;  %v698_v61 = vadd.f32 %v1188_v30, %v676_v55 }
 0x14a   :  { %v687_v56 = vadd.f32 %v1188_v30, %v648_v54  ;;  %v714_v2 = vmax.f32 %v698_v61, 0.0 }
 0x14c   :  { %v703_v59 = vmax.f32 %v687_v56, 0.0 }
 0x14d   :  { %v677_v60 = vpop.f32.mrf.mxu3 }
 0x14e   :  { %v920_v62 = vpack.c.bf16 %v703_v59, %v702_v58  ;;  %v678_v63 = vadd.f32 %v677_v60, %v556_v26  ;;  %v541_v26 = vpop.f32.mrf.mxu1 }
 0x14f   :  { %v650_v0 = vpop.f32.mrf.mxu2 }
 0x150   :  { %952 = vst [vmem:[%s1237_s7 + $0x8] sm:$0xff] %v920_v62   ;;  %v699_v1 = vadd.f32 %v1188_v30, %v678_v63  ;;  %v651_v5 = vadd.f32 %v650_v0, %v529_v46 }
 0x152   :  { %v715_v3 = vmax.f32 %v699_v1, 0.0  ;;  %v688_v8 = vadd.f32 %v1188_v30, %v651_v5 }
 0x154   :  { %v950_v4 = vpack.c.bf16 %v715_v3, %v714_v2  ;;  %v704_v11 = vmax.f32 %v688_v8, 0.0 }
 0x156   :  { %958 = vst [vmem:[%s1237_s7 + $0x38] sm:$0xff] %v950_v4   ;;  %v544_v35 = vpop.f32.mrf.mxu1 }
 0x157   :  { %v652_v7 = vpop.f32.mrf.mxu2 }
 0x158   :  { %v653_v9 = vadd.f32 %v652_v7, %v531_v57 }
 0x15a   :  { %v689_v10 = vadd.f32 %v1188_v30, %v653_v9 }
 0x15c   :  { %v705_v12 = vmax.f32 %v689_v10, 0.0 }
 0x15e   :  { %v925_v13 = vpack.c.bf16 %v705_v12, %v704_v11  ;;  %v546_v39 = vpop.f32.mrf.mxu1 }
 0x15f   :  { %v655_v15 = vpop.f32.mrf.mxu2 }
 0x160   :  { %953 = vst [vmem:[%s1237_s7 + $0x10] sm:$0xff] %v925_v13   ;;  %v656_v16 = vadd.f32 %v655_v15, %v534_v6 }
 0x162   :  { %v690_v18 = vadd.f32 %v1188_v30, %v656_v16 }
 0x164   :  { %v706_v22 = vmax.f32 %v690_v18, 0.0 }
 0x167   :  { %v657_v17 = vpop.f32.mrf.mxu2 }
 0x168   :  { %v658_v19 = vadd.f32 %v657_v17, %v536_v14 }
 0x16a   :  { %v691_v21 = vadd.f32 %v1188_v30, %v658_v19 }
 0x16c   :  { %v707_v23 = vmax.f32 %v691_v21, 0.0 }
 0x16e   :  { %v930_v24 = vpack.c.bf16 %v707_v23, %v706_v22 }
 0x16f   :  { %v660_v25 = vpop.f32.mrf.mxu2 }
 0x170   :  { %954 = vst [vmem:[%s1237_s7 + $0x18] sm:$0xff] %v930_v24   ;;  %v661_v27 = vadd.f32 %v660_v25, %v539_v20 }
 0x172   :  { %v692_v29 = vadd.f32 %v1188_v30, %v661_v27 }
 0x174   :  { %v708_v33 = vmax.f32 %v692_v29, 0.0 }
 0x177   :  { %v662_v28 = vpop.f32.mrf.mxu2 }
 0x178   :  { %v663_v31 = vadd.f32 %v662_v28, %v541_v26 }
 0x17a   :  { %v693_v32 = vadd.f32 %v1188_v30, %v663_v31 }
 0x17c   :  { %v709_v34 = vmax.f32 %v693_v32, 0.0 }
 0x17e   :  { %v935_v36 = vpack.c.bf16 %v709_v34, %v708_v33 }
 0x17f   :  { %v665_v37 = vpop.f32.mrf.mxu2 }
 0x180   :  { %955 = vst [vmem:[%s1237_s7 + $0x20] sm:$0xff] %v935_v36   ;;  %v666_v38 = vadd.f32 %v665_v37, %v544_v35 }
 0x182   :  { %v694_v41 = vadd.f32 %v1188_v30, %v666_v38 }
 0x184   :  { %v710_v44 = vmax.f32 %v694_v41, 0.0 }
 0x187   :  { %v667_v40 = vpop.f32.mrf.mxu2 }
 0x188   :  { %v668_v42 = vadd.f32 %v667_v40, %v546_v39 }
 0x18a   :  { %v695_v43 = vadd.f32 %v1188_v30, %v668_v42 }
 0x18c   :  { %v711_v45 = vmax.f32 %v695_v43, 0.0 }
 0x18e   :  { %v940_v46 = vpack.c.bf16 %v711_v45, %v710_v44 }
 0x190   :  { %956 = vst [vmem:[%s1237_s7 + $0x28] sm:$0xff] %v940_v46  }

</bundles_post_ra>
